<compile_context>
chip_gen: v7x
topology: tpu7x:2x2x1
jax: 0.10.0
libtpu: 0.0.40
codegen_flags: <defaults>
</compile_context>

<pallas_src>
import functools

import jax
import jax.numpy as jnp
from jax import lax
from jax.experimental import pallas as pl
from jax.experimental.pallas import tpu as pltpu


def _iln_kernel(x_ref, rg0_ref, rg1_ref, beta_ref, o_ref, *,
                eps, hw_valid, needs_mask,
                inv_hw, inv_c, inv_in_den, inv_ln_den):
    # x_ref: (bb, C, HWp) block (bb batch elems, full C, padded spatial).
    x = x_ref[...].astype(jnp.float32)                 # compute in f32

    if needs_mask:
        lane = lax.broadcasted_iota(jnp.int32, x.shape, 2)
        valid = lane < hw_valid
        xs = jnp.where(valid, x, 0.0)
    else:
        xs = x

    # ---- instance-norm stats: per-(b,c) mean + centered sum-of-squares ------
    in_mean = jnp.sum(xs, axis=2, keepdims=True) * inv_hw        # (bb, C, 1)
    d = x - in_mean
    dd = d * d
    if needs_mask:
        dd = jnp.where(valid, dd, 0.0)
    in_ss = jnp.sum(dd, axis=2, keepdims=True)                   # (bb, C, 1)
    inv_in = lax.rsqrt(in_ss * inv_in_den + eps)                 # (bb, C, 1) EUP

    # ---- layer-norm stats derived exactly from the instance stats -----------
    ln_mean = jnp.sum(in_mean, axis=1, keepdims=True) * inv_c    # (bb, 1, 1)
    dm = in_mean - ln_mean
    ln_ss = (jnp.sum(in_ss, axis=1, keepdims=True)
             + float(hw_valid) * jnp.sum(dm * dm, axis=1, keepdims=True))
    inv_ln = lax.rsqrt(ln_ss * inv_ln_den + eps)                 # (bb, 1, 1)

    # ---- per-channel FMA coefficients (tiny tensors) -------------------------
    rg0 = rg0_ref[...]       # (1, C, 1)  == gamma * softmax(rho)[..., 0]
    rg1 = rg1_ref[...]       # (1, C, 1)  == gamma * softmax(rho)[..., 1]
    beta = beta_ref[...]     # (1, C, 1)
    a = rg0 * inv_in + rg1 * inv_ln                              # (bb, C, 1)
    b = beta - rg0 * (in_mean * inv_in) - rg1 * (ln_mean * inv_ln)

    # ---- single broadcast multiply-add over the full block -------------------
    o_ref[...] = (a * x + b).astype(o_ref.dtype)


def _select_batch_block(B, per_elem_bytes, budget):
    """Largest divisor of B fitting the VMEM budget, keeping >=2 grid steps
    when B > 1 (so DMA/compute pipelining and megacore sharding stay alive)."""
    best = 1
    min_steps = min(B, 2)
    for cand in range(1, B + 1):
        if B % cand != 0:
            continue
        if cand * per_elem_bytes > budget:
            continue
        if B // cand < min_steps:
            continue
        best = cand
    return best


def iln_forward(x, rho, gamma, beta, eps=1e-5):
    """x: (B, C, H, W) NCHW; rho: (1, C, 2); gamma/beta: (1, C, 1, 1)."""
    B, C, H, W = x.shape
    HW = H * W
    HW_pad = ((HW + 127) // 128) * 128           # lane-dense spatial extent
    needs_mask = HW_pad != HW

    xr = x.reshape(B, C, HW)
    if needs_mask:
        xr = jnp.pad(xr, ((0, 0), (0, 0), (0, HW_pad - HW)))

    # Parameter glue (tiny, one-time XLA ops): softmax over rho's last dim and
    # fold gamma in, already shaped (1, C, 1) so no in-kernel relayout.
    rho_sm = jax.nn.softmax(rho.astype(jnp.float32), axis=2)     # (1, C, 2)
    g = gamma.reshape(1, C, 1).astype(jnp.float32)
    rg0 = rho_sm[:, :, 0:1] * g                                  # (1, C, 1)
    rg1 = rho_sm[:, :, 1:2] * g                                  # (1, C, 1)
    bt = beta.reshape(1, C, 1).astype(jnp.float32)               # (1, C, 1)

    # Footprint per batch element inside one grid step:
    # double-buffered in + out blocks (input dtype) + ~5 live f32 temporaries.
    itemsize = jnp.dtype(x.dtype).itemsize
    elem = C * HW_pad
    per_elem_bytes = 4 * elem * itemsize + 5 * elem * 4

    # Pick the batch-block size against a conservative portable budget
    # (default scoped VMEM is 16 MiB on v5e, 32 MiB on v6e/v7x).
    budget = (12 << 20)
    bb = _select_batch_block(B, per_elem_bytes, budget)

    # If even one batch element overflows the default scoped budget, raise the
    # limit toward physical VMEM.
    est_vmem = bb * per_elem_bytes + (1 << 20)
    vmem_limit = None
    if est_vmem > (16 << 20):
        try:
            phys = pltpu.get_tpu_info().vmem_capacity_bytes
        except Exception:
            phys = 64 << 20  # conservative (v7x per-TC VMEM)
        vmem_limit = int(min(max(est_vmem, 16 << 20), int(phys * 0.9)))

    kernel = functools.partial(
        _iln_kernel,
        eps=float(eps),
        hw_valid=HW,
        needs_mask=needs_mask,
        inv_hw=1.0 / HW,
        inv_c=1.0 / C,
        inv_in_den=1.0 / max(HW - 1, 1),
        inv_ln_den=1.0 / max(C * HW - 1, 1),
    )

    out = pl.pallas_call(
        kernel,
        out_shape=jax.ShapeDtypeStruct((B, C, HW_pad), x.dtype),
        grid=(B // bb,),
        in_specs=[
            pl.BlockSpec((bb, C, HW_pad), lambda i: (i, 0, 0)),   # x block
            pl.BlockSpec((1, C, 1), lambda i: (0, 0, 0)),         # gamma*rho0
            pl.BlockSpec((1, C, 1), lambda i: (0, 0, 0)),         # gamma*rho1
            pl.BlockSpec((1, C, 1), lambda i: (0, 0, 0)),         # beta
        ],
        out_specs=pl.BlockSpec((bb, C, HW_pad), lambda i: (i, 0, 0)),
        compiler_params=pltpu.CompilerParams(
            dimension_semantics=("parallel",),
            vmem_limit_bytes=vmem_limit),
    )(xr, rg0, rg1, bt)

    if needs_mask:
        out = out[:, :, :HW]
    return out.reshape(B, C, H, W)


def _iln_reference(x, rho, gamma, beta, eps=1e-5):
    # Pure-JAX reference mirroring the PyTorch forward (unbiased variance).
    x = x.astype(jnp.float32)
    in_mean = jnp.mean(x, axis=(2, 3), keepdims=True)
    in_var = jnp.var(x, axis=(2, 3), keepdims=True, ddof=1)
    out_in = (x - in_mean) / jnp.sqrt(in_var + eps)
    ln_mean = jnp.mean(x, axis=(1, 2, 3), keepdims=True)
    ln_var = jnp.var(x, axis=(1, 2, 3), keepdims=True, ddof=1)
    out_ln = (x - ln_mean) / jnp.sqrt(ln_var + eps)
    rho_sm = jax.nn.softmax(rho, axis=2)
    rho0 = rho_sm[:, :, 0][:, :, None, None]
    rho1 = rho_sm[:, :, 1][:, :, None, None]
    out = rho0 * out_in + rho1 * out_ln
    return out * gamma + beta


if __name__ == "__main__":
    def make_params(C):
        # deterministic parameter init, matching ILN.__init__ (using_bn=False)
        rho = jnp.concatenate(
            [jnp.full((1, C, 1), 1.0, jnp.float32),
             jnp.full((1, C, 1), 3.2, jnp.float32)], axis=2)     # (1, C, 2)
        gamma = jnp.ones((1, C, 1, 1), jnp.float32)
        beta = jnp.zeros((1, C, 1, 1), jnp.float32)
        return rho, gamma, beta

    key = jax.random.PRNGKey(0)
    k1, k2, k3 = jax.random.split(key, 3)

    # Case 1: lane-aligned spatial (16*16 = 256), B=2.
    B, C, H, W = 2, 4, 16, 16
    x = jax.random.normal(k1, (B, C, H, W), dtype=jnp.float32)
    rho, gamma, beta = make_params(C)
    out = jax.block_until_ready(iln_forward(x, rho, gamma, beta, eps=1e-5))
    ref = _iln_reference(x, rho, gamma, beta, eps=1e-5)
    assert out.shape == (B, C, H, W)
    assert jnp.max(jnp.abs(out - ref)) < 1e-4, "mismatch vs reference (aligned)"

    # Case 2: non-aligned spatial (14*14 = 196 -> padded/masked to 256), B=1.
    B2, C2, H2, W2 = 1, 6, 14, 14
    x2 = jax.random.normal(k2, (B2, C2, H2, W2), dtype=jnp.float32)
    rho2, gamma2, beta2 = make_params(C2)
    out2 = jax.block_until_ready(iln_forward(x2, rho2, gamma2, beta2, eps=1e-5))
    ref2 = _iln_reference(x2, rho2, gamma2, beta2, eps=1e-5)
    assert out2.shape == (B2, C2, H2, W2)
    assert jnp.max(jnp.abs(out2 - ref2)) < 1e-4, "mismatch vs reference (padded)"

    # Case 3: larger batch, small spatial -> exercises bb > 1 (batched block).
    B3, C3, H3, W3 = 8, 4, 8, 8
    x3 = jax.random.normal(k3, (B3, C3, H3, W3), dtype=jnp.float32)
    rho3, gamma3, beta3 = make_params(C3)
    out3 = jax.block_until_ready(iln_forward(x3, rho3, gamma3, beta3, eps=1e-5))
    ref3 = _iln_reference(x3, rho3, gamma3, beta3, eps=1e-5)
    assert out3.shape == (B3, C3, H3, W3)
    assert jnp.max(jnp.abs(out3 - ref3)) < 1e-4, "mismatch vs reference (batched)"

    print("KERNEL_OK")
</pallas_src>

<mosaic_0001>
module attributes {stable_mosaic.version = 11 : i64} {
  func.func @_iln_kernel(%arg0: i32, %arg1: memref<1x4x256xf32, #tpu.memory_space<vmem>>, %arg2: memref<1x4x1xf32, #tpu.memory_space<vmem>>, %arg3: memref<1x4x1xf32, #tpu.memory_space<vmem>>, %arg4: memref<1x4x1xf32, #tpu.memory_space<vmem>>, %arg5: memref<1x4x256xf32, #tpu.memory_space<vmem>>) attributes {dimension_semantics = [#tpu.dimension_semantics<parallel>], iteration_bounds = array<i64: 2>, scalar_prefetch = 0 : i64, scratch_operands = 0 : i64, tpu.core_type = #tpu.core_type<tc>, window_params = [{transform_indices = @transform_0, window_bounds = array<i64: 1, 4, 256>}, {pipeline_mode = #tpu.pipeline_mode<synchronous>, transform_indices = @transform_1, window_bounds = array<i64: 1, 4, 1>}, {pipeline_mode = #tpu.pipeline_mode<synchronous>, transform_indices = @transform_2, window_bounds = array<i64: 1, 4, 1>}, {pipeline_mode = #tpu.pipeline_mode<synchronous>, transform_indices = @transform_3, window_bounds = array<i64: 1, 4, 1>}, {transform_indices = @transform_4, window_bounds = array<i64: 1, 4, 256>}]} {
    %c0 = arith.constant 0 : index
    %c0_0 = arith.constant 0 : index
    %c0_1 = arith.constant 0 : index
    %0 = vector.load %arg1[%c0, %c0_0, %c0_1] : memref<1x4x256xf32, #tpu.memory_space<vmem>>, vector<1x4x256xf32>
    %cst = arith.constant dense<0.000000e+00> : vector<1x4xf32>
    %1 = vector.multi_reduction <add>, %0, %cst [2] : vector<1x4x256xf32> to vector<1x4xf32>
    %2 = vector.shape_cast %1 : vector<1x4xf32> to vector<1x4x1xf32>
    %cst_2 = arith.constant 3.906250e-03 : f32
    %3 = vector.broadcast %cst_2 : f32 to vector<1x4x1xf32>
    %4 = arith.mulf %2, %3 : vector<1x4x1xf32>
    %5 = vector.broadcast %4 : vector<1x4x1xf32> to vector<1x4x256xf32>
    %6 = arith.subf %0, %5 : vector<1x4x256xf32>
    %7 = arith.mulf %6, %6 : vector<1x4x256xf32>
    %cst_3 = arith.constant dense<0.000000e+00> : vector<1x4xf32>
    %8 = vector.multi_reduction <add>, %7, %cst_3 [2] : vector<1x4x256xf32> to vector<1x4xf32>
    %9 = vector.shape_cast %8 : vector<1x4xf32> to vector<1x4x1xf32>
    %cst_4 = arith.constant 0.00392156886 : f32
    %10 = vector.broadcast %cst_4 : f32 to vector<1x4x1xf32>
    %11 = arith.mulf %9, %10 : vector<1x4x1xf32>
    %cst_5 = arith.constant 9.99999974E-6 : f32
    %12 = vector.broadcast %cst_5 : f32 to vector<1x4x1xf32>
    %13 = arith.addf %11, %12 : vector<1x4x1xf32>
    %14 = math.rsqrt %13 : vector<1x4x1xf32>
    %cst_6 = arith.constant dense<0.000000e+00> : vector<1x1xf32>
    %15 = vector.multi_reduction <add>, %4, %cst_6 [1] : vector<1x4x1xf32> to vector<1x1xf32>
    %16 = vector.shape_cast %15 : vector<1x1xf32> to vector<1x1x1xf32>
    %cst_7 = arith.constant 2.500000e-01 : f32
    %17 = vector.broadcast %cst_7 : f32 to vector<1x1x1xf32>
    %18 = arith.mulf %16, %17 : vector<1x1x1xf32>
    %19 = vector.broadcast %18 : vector<1x1x1xf32> to vector<1x4x1xf32>
    %20 = arith.subf %4, %19 : vector<1x4x1xf32>
    %cst_8 = arith.constant dense<0.000000e+00> : vector<1x1xf32>
    %21 = vector.multi_reduction <add>, %9, %cst_8 [1] : vector<1x4x1xf32> to vector<1x1xf32>
    %22 = vector.shape_cast %21 : vector<1x1xf32> to vector<1x1x1xf32>
    %23 = arith.mulf %20, %20 : vector<1x4x1xf32>
    %cst_9 = arith.constant dense<0.000000e+00> : vector<1x1xf32>
    %24 = vector.multi_reduction <add>, %23, %cst_9 [1] : vector<1x4x1xf32> to vector<1x1xf32>
    %25 = vector.shape_cast %24 : vector<1x1xf32> to vector<1x1x1xf32>
    %cst_10 = arith.constant 2.560000e+02 : f32
    %26 = vector.broadcast %cst_10 : f32 to vector<1x1x1xf32>
    %27 = arith.mulf %26, %25 : vector<1x1x1xf32>
    %28 = arith.addf %22, %27 : vector<1x1x1xf32>
    %cst_11 = arith.constant 9.77517105E-4 : f32
    %29 = vector.broadcast %cst_11 : f32 to vector<1x1x1xf32>
    %30 = arith.mulf %28, %29 : vector<1x1x1xf32>
    %cst_12 = arith.constant 9.99999974E-6 : f32
    %31 = vector.broadcast %cst_12 : f32 to vector<1x1x1xf32>
    %32 = arith.addf %30, %31 : vector<1x1x1xf32>
    %33 = math.rsqrt %32 : vector<1x1x1xf32>
    %c0_13 = arith.constant 0 : index
    %c0_14 = arith.constant 0 : index
    %c0_15 = arith.constant 0 : index
    %34 = vector.load %arg2[%c0_13, %c0_14, %c0_15] : memref<1x4x1xf32, #tpu.memory_space<vmem>>, vector<1x4x1xf32>
    %c0_16 = arith.constant 0 : index
    %c0_17 = arith.constant 0 : index
    %c0_18 = arith.constant 0 : index
    %35 = vector.load %arg3[%c0_16, %c0_17, %c0_18] : memref<1x4x1xf32, #tpu.memory_space<vmem>>, vector<1x4x1xf32>
    %c0_19 = arith.constant 0 : index
    %c0_20 = arith.constant 0 : index
    %c0_21 = arith.constant 0 : index
    %36 = vector.load %arg4[%c0_19, %c0_20, %c0_21] : memref<1x4x1xf32, #tpu.memory_space<vmem>>, vector<1x4x1xf32>
    %37 = arith.mulf %34, %14 : vector<1x4x1xf32>
    %38 = vector.broadcast %33 : vector<1x1x1xf32> to vector<1x4x1xf32>
    %39 = arith.mulf %35, %38 : vector<1x4x1xf32>
    %40 = arith.addf %37, %39 : vector<1x4x1xf32>
    %41 = arith.mulf %4, %14 : vector<1x4x1xf32>
    %42 = arith.mulf %34, %41 : vector<1x4x1xf32>
    %43 = arith.subf %36, %42 : vector<1x4x1xf32>
    %44 = arith.mulf %18, %33 : vector<1x1x1xf32>
    %45 = vector.broadcast %44 : vector<1x1x1xf32> to vector<1x4x1xf32>
    %46 = arith.mulf %35, %45 : vector<1x4x1xf32>
    %47 = arith.subf %43, %46 : vector<1x4x1xf32>
    %48 = vector.broadcast %40 : vector<1x4x1xf32> to vector<1x4x256xf32>
    %49 = arith.mulf %48, %0 : vector<1x4x256xf32>
    %50 = vector.broadcast %47 : vector<1x4x1xf32> to vector<1x4x256xf32>
    %51 = arith.addf %49, %50 : vector<1x4x256xf32>
    %c0_22 = arith.constant 0 : index
    %c0_23 = arith.constant 0 : index
    %c0_24 = arith.constant 0 : index
    %52 = vector.load %arg5[%c0_22, %c0_23, %c0_24] : memref<1x4x256xf32, #tpu.memory_space<vmem>>, vector<1x4x256xf32>
    tpu.vector_store %arg5[%c0_22, %c0_23, %c0_24], %51 {strides = array<i32>} : memref<1x4x256xf32, #tpu.memory_space<vmem>>, vector<1x4x256xf32>,
    return
  }
  func.func @transform_0(%arg0: i32) -> (i32, i32, i32) {
    %c0_i32 = arith.constant 0 : i32
    %c0_i32_0 = arith.constant 0 : i32
    %c0_i32_1 = arith.constant 0 : i32
    return %arg0, %c0_i32, %c0_i32_0 : i32, i32, i32
  }
  func.func @transform_1(%arg0: i32) -> (i32, i32, i32) {
    %c0_i32 = arith.constant 0 : i32
    %c0_i32_0 = arith.constant 0 : i32
    %c0_i32_1 = arith.constant 0 : i32
    %c0_i32_2 = arith.constant 0 : i32
    return %c0_i32, %c0_i32_0, %c0_i32_1 : i32, i32, i32
  }
  func.func @transform_2(%arg0: i32) -> (i32, i32, i32) {
    %c0_i32 = arith.constant 0 : i32
    %c0_i32_0 = arith.constant 0 : i32
    %c0_i32_1 = arith.constant 0 : i32
    %c0_i32_2 = arith.constant 0 : i32
    return %c0_i32, %c0_i32_0, %c0_i32_1 : i32, i32, i32
  }
  func.func @transform_3(%arg0: i32) -> (i32, i32, i32) {
    %c0_i32 = arith.constant 0 : i32
    %c0_i32_0 = arith.constant 0 : i32
    %c0_i32_1 = arith.constant 0 : i32
    %c0_i32_2 = arith.constant 0 : i32
    return %c0_i32, %c0_i32_0, %c0_i32_1 : i32, i32, i32
  }
  func.func @transform_4(%arg0: i32) -> (i32, i32, i32) {
    %c0_i32 = arith.constant 0 : i32
    %c0_i32_0 = arith.constant 0 : i32
    %c0_i32_1 = arith.constant 0 : i32
    return %arg0, %c0_i32, %c0_i32_0 : i32, i32, i32
  }
}

</mosaic_0001>

<bundles_post_ra>
// kernel: tpu_custom_call.1
= control target key start
LH: loop header
LB: loop body
LE: loop exit
PB: predicated region body
PF: predicated region fallthrough
CT: control target
= control target key end

     0   :  { %9 = vsyncpa [#allocation3], 0  ;;  %s782_s0 = inlined_call_operand.hbm [shape: f32[2,4,256], index: 0, kind: input, shape index: {}]   ;;  %s783_s1 = inlined_call_operand.vmem [shape: f32[1,4,1], index: 1, kind: input, shape index: {}]   ;;  %s784_s2 = inlined_call_operand.vmem [shape: f32[1,4,1], index: 2, kind: input, shape index: {}]   ;;  %s785_s3 = inlined_call_operand.vmem [shape: f32[1,4,1], index: 3, kind: input, shape index: {}]   ;;  %s786_s4 = inlined_call_operand.hbm [shape: f32[2,4,256], index: 4, kind: output, shape index: {}]  }
   0x1   :  { %11 = vsyncpa [#allocation3 + $0x1], 0 }
   0x2   :  { %12 = vsyncpa [#allocation4], 0 }
   0x3   :  { %14 = vsyncpa [#allocation4 + $0x1], 0  ;;  %s590_s15 = smov 0   ;;  %s592_s16 = smov 0  }
   0x4   :  { %s594_s17 = smov 0   ;;  %s596_s18 = smov 0  }
   0x5 LB: > { %s611_s19 = sadd.s32 4294967295, %s559_s18   ;;  %s392_s20 = sadd.s32 4294967294, %s559_s18   ;;  %s559_s18 = sphi %s596_s18, %s801_s18   ;;  %s555_s17 = sphi %s594_s17, %s800_s17   ;;  %s551_s16 = sphi %s592_s16, %s799_s16   ;;  %s547_s15 = sphi %s590_s15, %s798_s15  }
   0x6   : > { %s615_s21 = sadd.s32 1, %s559_s18   ;;  %s27_s22 = sadd.s32 1, %s555_s17 }
   0x7   : > { %s24_s23 = ssub.s32 %s559_s18, %s615_s21  ;;  %p34_p0 = scmp.ne.s32.totalorder %s555_s17, %s551_s16 }
   0x8   : > { %p25_p1 = scmp.eq.s32.totalorder %s24_s23, 0  ;;  %p35_p2 = scmp.eq.s32.totalorder %s559_s18, 0 }
   0x9   : > { %p40_p3 = scmp.ne.s32.totalorder %s551_s16, %s547_s15  ;;  %p41_p4 = scmp.eq.s32.totalorder %s611_s19, 0 }
   0xa   : > { %s627_s24 = scalar_select %p25_p1, %s555_s17, %s27_s22  }
   0xb   : > { %p629_p5 = por %p35_p2, %p34_p0  ;;  %p633_p6 = por %p41_p4, %p40_p3 }
   0xc   : > { %p127_p7 = scmp.eq.s32.totalorder %s611_s19, 1  ;;  %p133_p8 = scmp.eq.s32.totalorder %s392_s20, 1 }
   0xd   : > { %p420_p10 = scmp.lt.s32.totalorder %s559_s18, 2  ;;  %s162_s29 = sand.u32 1, %s555_s17  }
   0xe   : > { %p640_p11 = por %p127_p7, %p34_p0  ;;  %p644_p12 = por %p133_p8, %p40_p3 }
   0xf   : > { %s406_s30 = sshll.u32 %s559_s18, 7  ;;  %s395_s5 = sshll.u32 %s162_s29, 3 }
  0x10   : > { %s790_s27 = scalar_select %p640_p11, 1, 0 }
  0x11   : > { %s791_s28 = scalar_select %p644_p12, 1, 0 }
  0x12   : > { %s653_s8 = scalar_lea.hbm %s782_s0, %s406_s30  ;;  %s166_s9 = scalar_lea.vmem [#allocation2], %s395_s5 }
  0x13   : > { %s174_s10 = sshll.u32 %s166_s9, 4  ;;  %p657_p13 = pnand %p420_p10, %p629_p5  ;;  %s661_s10 = int_to_ptr.vmem [resolvable:$true] %s174_s10 }
  0x14   : > { %s163_s12 = scalar_lea.sflag [#allocation3], %s162_s29  ;;  %s463_s13 = scalar_lea.hbm %s653_s8, 128 }
  0x15   : > { %p464_p2 = scmp.ne.s32.totalorder %s653_s8, %s463_s13  ;;  %p465_p3 = pneg %p657_p13 }
  0x16   : > { %s468_s22 = scalar_lea.hbm %s782_s0, 256  ;;  %p469_p5 = scmp.lt.u32.totalorder %s653_s8, %s782_s0 }
  0x17   : > { %p466_p4 = pnand %p465_p3, %p464_p2  ;;  %p470_p8 = scmp.lt.u32.totalorder %s468_s22, %s463_s13 }
  0x18   : > { %p472_p9 = scmp.lt.u32.totalorder %s463_s13, %s653_s8 }
  0x19   : > { %p467_p7 = pneg %p466_p4  ;;  %p471_p10 = por %p470_p8, %p469_p5 }
  0x1b   : > { %p473_p0 = por %p472_p9, %p471_p10 }
  0x1d   : > { %p474_p1 = pnand %p473_p0, %p467_p7 }
  0x1f   : > { %477 = shalt.err (!%p474_p1)
}
  0x20   : > { %s478_s29 = scalar_lea.vmem %s661_s10, 128  ;;  %s561_s30 = smov [#allocation2]  }
  0x21   : > { %p479_p2 = scmp.ne.s32.totalorder %s661_s10, %s478_s29  ;;  %s483_s5 = sshll.u32 %s561_s30, 4  ;;  %s484_s5 = int_to_ptr.vmem [resolvable:$false] %s483_s5 }
  0x22   : > { %s485_s6 = scalar_lea.vmem %s484_s5, 256  ;;  %p486_p11 = scmp.lt.s32.totalorder %s661_s10, %s484_s5 }
  0x23   : > { %p481_p4 = pnand %p479_p2, %p465_p3  ;;  %p487_p5 = scmp.lt.s32.totalorder %s485_s6, %s478_s29 }
  0x25   : > { %p482_p12 = pneg %p481_p4  ;;  %p488_p8 = por %p487_p5, %p486_p11 }
  0x27   : > { %p489_p9 = pnand %p488_p8, %p482_p12 }
  0x29   : > { %492 = shalt.err (!%p489_p9)
}
  0x2a   : > { %415 = dma.hbm_to_vmem [thread:$0]  (!%p657_p13), %s653_s8, 128, %s661_s10, %s163_s12  }
  0x2b   : > { %p793_p0 = scmp.lt.s32.totalorder %s559_s18, 3  ;;  %p794_p1 = scmp.ge.s32.totalorder %s559_s18, 1 }
  0x2d   : > { %p180_p3 = pnand %p794_p1, %p793_p0 }
  0x2e   : > { %s695_s7 = sand.u32 (!%p180_p3), 1, %s551_s16  }
  0x2f   : > { %183 = sbr.rel (%p180_p3) target bundleno = 542 (0x21e), region = 36  ;;  %s399_s9 = sshll.u32 (!%p180_p3), %s695_s7, 3 }
  0x30   : > { %s186_s13 = scalar_lea.sflag (!%p180_p3), [#allocation3], %s695_s7  ;;  %s189_s11 = scalar_lea.vmem (!%p180_p3), [#allocation2], %s399_s9 }
  0x36   : > { %538 = dma.done.wait (%p633_p6), %s186_s13, 128  }
  0x37   : > { %540 = vsyncadd (%p633_p6), %s186_s13, 4294967168  ;;  %vm218_vm0 = vcmask 1043456   ;;  %v705_v0 = vld [vmem:[%s189_s11] sm:$0xff]  ;;  %v562_v5 = vmov 839922192   ;;  %v229_v7 = vlaneseq  ;;  %v563_v20 = vmov 0  }
  0x38   : > { %v709_v1 = vcombine.high %v705_v0, %v705_v0  ;;  %v219_v2 = vsel %vm218_vm0, %v705_v0, 0.0  ;;  %v227_v6 = vunpack.c.l.s4 %v562_v5  ;;  %456 = vset.pattern.permute.xlu1 %v563_v20  ;;  %457 = vset.pattern.permute.xlu0 %v563_v20  ;;  %v276_v54 = vld [vmem:[%s783_s1] sm:$0xf]  ;;  %s407_s22 = sshll.u32 %s611_s19, 7  ;;  %s213_s23 = scalar_lea.vmem [#allocation5], %s399_s9 }
  0x39   : > { %v230_v9 = vshrl.u32 %v229_v7, 7  ;;  %v277_v55 = vld [vmem:[%s784_s2] sm:$0xf]  ;;  %s322_s25 = sshll.u32 %s213_s23, 4  ;;  %s738_s5 = scalar_lea.hbm %s786_s4, %s407_s22  ;;  %s740_s25 = int_to_ptr.vmem [resolvable:$true] %s322_s25 }
  0x3a   : > { %v220_v3 = vsel %vm218_vm0, %v709_v1, 0.0  ;;  %v228_v8 = vunpack.c.0.s8 %v227_v6  ;;  %v278_v61 = vld [vmem:[%s785_s3] sm:$0xf]  ;;  %s308_s6 = scalar_lea.sflag [#allocation4], %s695_s7  ;;  %s493_s13 = scalar_lea.vmem %s740_s25, 128 }
  0x3b   : > { %v221_v4 = vadd.f32 %v220_v3, %v219_v2  ;;  %p494_p6 = scmp.ne.s32.totalorder %s740_s25, %s493_s13  ;;  %p795_p11 = scmp.ne.s32.totalorder %s790_s27, 0 }
  0x3c   : > { %v231_v10 = vsub.s32 %v228_v8, %v230_v9  ;;  %s564_s19 = smov [#allocation5]  }
  0x3d   : > { %222 = vadd.xlane.f32.xlu0 %v221_v4  ;;  %p495_p12 = pnand %p494_p6, %p795_p11  ;;  %s497_s9 = sshll.u32 %s564_s19, 4  ;;  %s498_s9 = int_to_ptr.vmem [resolvable:$false] %s497_s9 }
  0x3e   : > { %s499_s11 = scalar_lea.vmem %s498_s9, 256  ;;  %p500_p7 = scmp.lt.s32.totalorder %s740_s25, %s498_s9 }
  0x3f   : > { %p496_p13 = pneg %p495_p12  ;;  %p501_p10 = scmp.lt.s32.totalorder %s499_s11, %s493_s13 }
  0x41   : > { %p502_p2 = por %p501_p10, %p500_p7 }
  0x43   : > { %p503_p4 = pnand %p502_p2, %p496_p13 }
  0xca   : > { %v223_v11 = vpop.xlane.xlu0 %222 }
  0xcb   : > { %v224_v12 = vmul.f32 0.00390625, %v223_v11 }
  0xcd   : > { %v232_v13 = vrot.slane %v224_v12, %v231_v10  ;;  %v247_v21 = vsel %vm218_vm0, %v224_v12, 0.0 }
  0xce   : > { %v248_v22 = vrot.slane %v247_v21, 4 }
  0xcf   : > { %v234_v14 = vsub.f32 %v705_v0, %v232_v13 }
  0xd0   : > { %v249_v23 = vadd.f32 %v248_v22, %v247_v21 }
  0xd1   : > { %v235_v15 = vmul.f32 %v234_v14, %v234_v14 }
  0xd2   : > { %v250_v24 = vrot.slane %v249_v23, 2 }
  0xd3   : > { %v237_v16 = vcombine.high %v235_v15, %v235_v15  ;;  %v239_v17 = vsel %vm218_vm0, %v235_v15, 0.0 }
  0xd4   : > { %v251_v25 = vadd.f32 %v250_v24, %v249_v23 }
  0xd5   : > { %v240_v18 = vsel %vm218_vm0, %v237_v16, 0.0 }
  0xd6   : > { %v241_v19 = vadd.f32 %v240_v18, %v239_v17  ;;  %v252_v26 = vrot.slane %v251_v25, 1 }
  0xd8   : > { %242 = vadd.xlane.f32.xlu0 %v241_v19  ;;  %v253_v27 = vadd.f32 %v252_v26, %v251_v25 }
  0xda   : > { %v254_v28 = vmul.f32 0.25, %v253_v27 }
  0xdc   : > { %v255_v29 = vsub.f32 %v224_v12, %v254_v28 }
  0xde   : > { %v263_v30 = vmul.f32 %v255_v29, %v255_v29 }
  0xe0   : > { %v264_v31 = vsel %vm218_vm0, %v263_v30, 0.0 }
  0xe1   : > { %v265_v32 = vrot.slane %v264_v31, 4 }
  0xe3   : > { %v266_v33 = vadd.f32 %v265_v32, %v264_v31 }
  0xe5   : > { %v267_v34 = vrot.slane %v266_v33, 2 }
  0xe7   : > { %v268_v35 = vadd.f32 %v267_v34, %v266_v33 }
  0xe9   : > { %v269_v39 = vrot.slane %v268_v35, 1 }
  0xeb   : > { %v270_v43 = vadd.f32 %v269_v39, %v268_v35 }
  0xed   : > { %v271_v47 = vmul.f32 256.0, %v270_v43 }
 0x165   : > { %v243_v36 = vpop.xlane.xlu0 %242 }
 0x166   : > { %v256_v37 = vsel %vm218_vm0, %v243_v36, 0.0  ;;  %v244_v41 = vmul.f32 0.003921569, %v243_v36 }
 0x167   : > { %v257_v38 = vrot.slane %v256_v37, 4 }
 0x168   : > { %v245_v45 = vadd.f32 1e-05, %v244_v41 }
 0x169   : > { %v258_v40 = vadd.f32 %v257_v38, %v256_v37 }
 0x16a   : > { %459 = vrsqrt.f32 %v245_v45 }
 0x16b   : > { %v259_v42 = vrot.slane %v258_v40, 2 }
 0x16d   : > { %v260_v44 = vadd.f32 %v259_v42, %v258_v40 }
 0x16f   : > { %v261_v46 = vrot.slane %v260_v44, 1 }
 0x171   : > { %v262_v48 = vadd.f32 %v261_v46, %v260_v44 }
 0x173   : > { %v272_v49 = vadd.f32 %v271_v47, %v262_v48 }
 0x174   : > { %v460_v52 = vpop.eup %459 }
 0x175   : > { %v273_v50 = vmul.f32 0.0009775171, %v272_v49  ;;  %v282_v53 = vmul.f32 %v460_v52, %v224_v12  ;;  %v279_v57 = vmul.f32 %v460_v52, %v276_v54 }
 0x177   : > { %v274_v51 = vadd.f32 1e-05, %v273_v50  ;;  %v283_v59 = vmul.f32 %v282_v53, %v276_v54 }
 0x179   : > { %461 = vrsqrt.f32 %v274_v51  ;;  %v284_v2 = vsub.f32 %v278_v61, %v283_v59 }
 0x183   : > { %v462_v56 = vpop.eup %461 }
 0x184   : > { %v280_v58 = vmul.f32 %v462_v56, %v277_v55  ;;  %v285_v60 = vmul.f32 %v462_v56, %v254_v28 }
 0x186   : > { %v281_v62 = vadd.f32 %v280_v58, %v279_v57  ;;  %v286_v63 = vmul.f32 %v285_v60, %v277_v55 }
 0x188   : > { %290 = vperm.xlu1 %456, %v281_v62   ;;  %v287_v3 = vsub.f32 %v284_v2, %v286_v63 }
 0x18c   : > { %297 = vperm.xlu1 %456, %v287_v3  }
 0x207   : > { %v291_v4 = vpop.permute.xlu1 %290 }
 0x208   : > { %v293_v5 = vmul.f32 %v291_v4, %v705_v0  ;;  %v294_v6 = vmul.f32 %v291_v4, %v709_v1 }
 0x20b   : > { %v298_v7 = vpop.permute.xlu1 %297 }
 0x20c   : > { %v300_v8 = vadd.f32 %v298_v7, %v293_v5  ;;  %v301_v9 = vadd.f32 %v298_v7, %v294_v6 }
 0x20e   : > { %v304_v10 = vcombine.low %v300_v8, %v301_v9 }
 0x210   : > { %306 = vst [vmem:[%s213_s23] sm:$0xff] %v304_v10 }
 0x211   : > { %506 = shalt.err (!%p503_p4)
}
 0x212   : > { %s507_s7 = scalar_lea.hbm %s738_s5, 128  ;;  %s511_s10 = scalar_lea.hbm %s786_s4, 256 }
 0x213   : > { %p508_p5 = scmp.ne.s32.totalorder %s738_s5, %s507_s7  ;;  %p512_p0 = scmp.lt.u32.totalorder %s738_s5, %s786_s4 }
 0x214   : > { %p513_p1 = scmp.lt.u32.totalorder %s511_s10, %s507_s7  ;;  %p515_p6 = scmp.lt.u32.totalorder %s507_s7, %s738_s5 }
 0x215   : > { %p509_p8 = pnand %p508_p5, %p795_p11 }
 0x216   : > { %p514_p3 = por %p513_p1, %p512_p0 }
 0x217   : > { %p510_p9 = pneg %p509_p8 }
 0x218   : > { %p516_p12 = por %p515_p6, %p514_p3 }
 0x21a   : > { %p517_p13 = pnand %p516_p12, %p510_p9 }
 0x21c   : > { %520 = shalt.err (!%p517_p13)
}
 0x21d   : > { %410 = dma.vmem_to_hbm [thread:$0]  (%p795_p11), %s740_s25, 128, %s738_s5, %s308_s6  }
 0x21e PF: > { %s334_s20 = sand.u32 1, %s547_s15   ;;  %p796_p7 = scmp.ne.s32.totalorder %s791_s28, 0 }
 0x21f   : > { %p797_p10 = scmp.ge.s32.totalorder %s559_s18, 2  ;;  %s335_s22 = scalar_lea.sflag [#allocation4], %s334_s20 }
 0x221   : > { %p417_p2 = pnand %p797_p10, %p796_p7 }
 0x223   : > { %542 = dma.done.wait (!%p417_p2), %s335_s22, 128  }
 0x224   : > { %544 = vsyncadd (!%p417_p2), %s335_s22, 4294967168  ;;  %p17_p4 = scmp.ge.s32.totalorder %s615_s21, 4   ;;  %s798_s15 = smov %s551_s16 }
 0x225   : > { %s799_s16 = smov %s555_s17  ;;  %s800_s17 = smov %s627_s24 }
 0x226   : > { %s801_s18 = smov %s615_s21  ;;  %19 = sbr.rel (!%p17_p4) target bundleno = 5 (0x5), region = 81 }
 0x22d   :  { %340 = vsyncpa [#allocation3], 1 }
 0x22e   :  { %342 = vsyncpa [#allocation3 + $0x1], 1 }
 0x22f   :  { %343 = vsyncpa [#allocation4], 1 }
 0x230   :  { %345 = vsyncpa [#allocation4 + $0x1], 1 }

</bundles_post_ra>
